<compile_context>
chip_gen: v7x
topology: tpu7x:2x2x1
jax: 0.10.0
libtpu: 0.0.40
codegen_flags: <defaults>
</compile_context>

<pallas_src>
import jax
import jax.numpy as jnp
from jax.experimental import pallas as pl
from jax.experimental.pallas import tpu as pltpu


_TILE_BYTES = 4 * 1024 * 1024          # ~4 MiB per block (dtype-aware rows)
_VMEM_LIMIT = 48 * 1024 * 1024         # safe on v5e/v6e/v7x physical VMEM


def _neg_scale_kernel(scale_ref, g_ref, o_ref):
    # grad_in = (-coeff) * grad_out; multiply in f32, cast back to grad dtype.
    o_ref[...] = (g_ref[...].astype(jnp.float32) * scale_ref[0]).astype(o_ref.dtype)


def _pick_tiles(total, itemsize):
    """Choose a lane-dense (rows, lanes) view and a row tile.

    Returns (lanes, rows, row_tile) or None if the size is ragged (not a
    multiple of 128 elements) and should use the plain-jnp fallback.
    """
    if total == 0:
        return None
    if total % 512 == 0:
        lanes = 512
    elif total % 128 == 0:
        lanes = 128
    else:
        return None
    rows = total // lanes
    row_tile = max(8, (_TILE_BYTES // (lanes * itemsize)) // 8 * 8)
    if rows <= row_tile:
        row_tile = rows            # single full-extent block (always legal)
    return lanes, rows, row_tile


def _neg_scale(g, coeff):
    """Backward pass: -coeff * g, via a tiled Pallas stream when possible."""
    scale = -jnp.asarray(coeff, jnp.float32)
    picked = _pick_tiles(g.size, jnp.dtype(g.dtype).itemsize)
    if picked is None:
        # Ragged / tiny tensors: one fused XLA pass is already optimal
        # (single read + write); no pad / slice round trips.
        return (g.astype(jnp.float32) * scale).astype(g.dtype)

    lanes, rows, row_tile = picked
    g2 = g.reshape(rows, lanes)                 # contiguous -> free reshape
    scale_arr = scale.reshape(1)                # SMEM scalar

    out = pl.pallas_call(
        _neg_scale_kernel,
        out_shape=jax.ShapeDtypeStruct((rows, lanes), g.dtype),
        grid=(pl.cdiv(rows, row_tile),),
        in_specs=[
            pl.BlockSpec(memory_space=pltpu.SMEM),            # (-coeff) scalar
            pl.BlockSpec((row_tile, lanes), lambda i: (i, 0)),  # grad tile
        ],
        out_specs=pl.BlockSpec((row_tile, lanes), lambda i: (i, 0)),
        compiler_params=pltpu.CompilerParams(
            dimension_semantics=("parallel",),
            vmem_limit_bytes=_VMEM_LIMIT,
        ),
    )(scale_arr, g2)
    return out.reshape(g.shape)


# ---------------------------------------------------------------------------
# custom_vjp plumbing: identity forward, -coeff * grad backward.
# coeff is a regular (traced) argument so changing it never retraces.
# ---------------------------------------------------------------------------
@jax.custom_vjp
def _grl_core(x, coeff):
    return x                                   # identity: zero HBM traffic


def _grl_core_fwd(x, coeff):
    return x, coeff


def _grl_core_bwd(coeff, g):
    # Cotangent for coeff is mathematically zero (output doesn't depend on it).
    return _neg_scale(g, coeff), jnp.zeros_like(coeff)


_grl_core.defvjp(_grl_core_fwd, _grl_core_bwd)


def grl(x, coeff=1.0):
    """Gradient Reversal Layer: identity forward, -coeff * grad backward."""
    return _grl_core(x, jnp.asarray(coeff, jnp.float32))


class GRL:
    """JAX/Pallas equivalent of the PyTorch GRL module (no parameters)."""

    def __init__(self):
        pass  # GRL.__init__ has no parameters

    def __call__(self, x, coeff=1.0):
        return grl(x, coeff)


if __name__ == "__main__":
    key = jax.random.PRNGKey(0)
    # NCHW, consistent with YOLOv5-style conv feature maps (small shapes).
    x = jax.random.normal(key, (2, 4, 16, 16), dtype=jnp.float32)

    module = GRL()

    # Forward must be exact identity (no copy kernel launched).
    y = module(x, 1.0)
    y = jax.block_until_ready(y)
    assert y.shape == x.shape and y.dtype == x.dtype
    assert bool(jnp.all(y == x))

    # Backward must reverse (and scale) the gradient — runs the Pallas kernel
    # (2*4*16*16 = 2048 elements -> a (4, 512) lane-dense block).
    coeff = 0.5
    grad = jax.grad(lambda v: jnp.sum(grl(v, coeff)))(x)
    grad = jax.block_until_ready(grad)
    assert grad.shape == x.shape and grad.dtype == x.dtype
    assert bool(jnp.allclose(grad, -coeff * jnp.ones_like(x)))

    # Ragged-size path (105 elements, not a multiple of 128) uses the fused
    # jnp fallback instead of pad/kernel/slice.
    x_r = jax.random.normal(jax.random.PRNGKey(1), (3, 5, 7), dtype=jnp.float32)
    grad_r = jax.grad(lambda v: jnp.sum(grl(v, 2.0)))(x_r)
    grad_r = jax.block_until_ready(grad_r)
    assert bool(jnp.allclose(grad_r, -2.0 * jnp.ones_like(x_r)))

    print("KERNEL_OK")
</pallas_src>

<mosaic_0001>
module attributes {stable_mosaic.version = 11 : i64} {
  func.func @_neg_scale_kernel(%arg0: i32, %arg1: memref<1xf32, #tpu.memory_space<smem>>, %arg2: memref<4x512xf32, #tpu.memory_space<vmem>>, %arg3: memref<4x512xf32, #tpu.memory_space<vmem>>) attributes {dimension_semantics = [#tpu.dimension_semantics<parallel>], iteration_bounds = array<i64: 1>, scalar_prefetch = 0 : i64, scratch_operands = 0 : i64, tpu.core_type = #tpu.core_type<tc>, window_params = [{transform_indices = @transform_0, window_bounds = array<i64: 1>}, {transform_indices = @transform_1, window_bounds = array<i64: 4, 512>}, {transform_indices = @transform_2, window_bounds = array<i64: 4, 512>}]} {
    %c0 = arith.constant 0 : index
    %c0_0 = arith.constant 0 : index
    %0 = vector.load %arg2[%c0, %c0_0] : memref<4x512xf32, #tpu.memory_space<vmem>>, vector<4x512xf32>
    %c0_1 = arith.constant 0 : index
    %1 = memref.load %arg1[%c0_1] : memref<1xf32, #tpu.memory_space<smem>>
    %2 = vector.broadcast %1 : f32 to vector<4x512xf32>
    %3 = arith.mulf %0, %2 : vector<4x512xf32>
    %c0_2 = arith.constant 0 : index
    %c0_3 = arith.constant 0 : index
    %4 = vector.load %arg3[%c0_2, %c0_3] : memref<4x512xf32, #tpu.memory_space<vmem>>, vector<4x512xf32>
    tpu.vector_store %arg3[%c0_2, %c0_3], %3 {strides = array<i32>} : memref<4x512xf32, #tpu.memory_space<vmem>>, vector<4x512xf32>,
    return
  }
  func.func @transform_0(%arg0: i32) -> i32 {
    %c0_i32 = arith.constant 0 : i32
    %c0_i32_0 = arith.constant 0 : i32
    return %c0_i32 : i32
  }
  func.func @transform_1(%arg0: i32) -> (i32, i32) {
    %c0_i32 = arith.constant 0 : i32
    %c0_i32_0 = arith.constant 0 : i32
    return %arg0, %c0_i32 : i32, i32
  }
  func.func @transform_2(%arg0: i32) -> (i32, i32) {
    %c0_i32 = arith.constant 0 : i32
    %c0_i32_0 = arith.constant 0 : i32
    return %arg0, %c0_i32 : i32, i32
  }
}

</mosaic_0001>

<bundles_post_ra>
// kernel: tpu_custom_call.1
= control target key start
LH: loop header
LB: loop body
LE: loop exit
PB: predicated region body
PF: predicated region fallthrough
CT: control target
= control target key end

     0   :  { %8 = vsyncpa [#allocation4], 0  ;;  %s142_s0 = inlined_call_operand.<no memory space> [shape: f32[1], index: 0, kind: input, shape index: {}]   ;;  %s143_s1 = inlined_call_operand.hbm [shape: f32[4,512], index: 1, kind: input, shape index: {}]   ;;  %s144_s2 = inlined_call_operand.hbm [shape: f32[4,512], index: 2, kind: output, shape index: {}]  }
   0x1   :  { %9 = vsyncpa [#allocation5], 0  ;;  %s98_s9 = smov [#allocation3]   ;;  %s50_s13 = scalar_lea.hbm %s143_s1, 256 }
   0x2   :  { %s18_s10 = sshll.u32 %s98_s9, 4  ;;  %p51_p0 = scmp.ne.s32.totalorder %s143_s1, %s50_s13  ;;  %s19_s10 = int_to_ptr.vmem [resolvable:$true] %s18_s10 }
   0x3   :  { %p54_p1 = scmp.lt.u32.totalorder %s50_s13, %s143_s1 }
   0x5   :  { %p56_p2 = pnand %p54_p1, %p51_p0 }
   0x7   :  { %59 = shalt.err (!%p56_p2)
}
   0x8   :  { %s60_s18 = scalar_lea.vmem %s19_s10, 256  ;;  %p65_p4 = scmp.lt.s32.totalorder %s19_s10, %s19_s10 }
   0x9   :  { %p61_p3 = scmp.ne.s32.totalorder %s19_s10, %s60_s18  ;;  %p66_p5 = scmp.lt.s32.totalorder %s60_s18, %s60_s18 }
   0xb   :  { %p67_p6 = por %p66_p5, %p65_p4 }
   0xd   :  { %p68_p7 = pnand %p67_p6, %p61_p3 }
   0xf   :  { %71 = shalt.err (!%p68_p7)
}
  0x10   :  { %21 = dma.hbm_to_vmem [thread:$0]  %s143_s1, 256, %s19_s10, [#allocation4]  }
  0x11   :  { %94 = dma.done.wait [#allocation4], 256  }
  0x12   :  { %95 = vsyncadd [#allocation4], 4294967040  ;;  %v28_v0 = vstv %s142_s0  ;;  %s99_s23 = smov [#allocation6]   ;;  %v25_v1 = vld [vmem:[#allocation3] sm:$0xff]  ;;  %v26_v2 = vld [vmem:[#allocation3 + $0x8] sm:$0xff] }
  0x13   :  { %s39_s24 = sshll.u32 %s99_s23, 4  ;;  %v29_v3 = vmul.f32 %v28_v0, %v25_v1  ;;  %v30_v4 = vmul.f32 %v28_v0, %v26_v2  ;;  %s40_s24 = int_to_ptr.vmem [resolvable:$true] %s39_s24 }
  0x14   :  { %s72_s25 = scalar_lea.vmem %s40_s24, 256  ;;  %p77_p9 = scmp.lt.s32.totalorder %s40_s24, %s40_s24 }
  0x15   :  { %31 = vst [vmem:[#allocation6] sm:$0xff] %v29_v3  ;;  %32 = vst [vmem:[#allocation6 + $0x8] sm:$0xff] %v30_v4  ;;  %p73_p8 = scmp.ne.s32.totalorder %s40_s24, %s72_s25  ;;  %p78_p10 = scmp.lt.s32.totalorder %s72_s25, %s72_s25 }
  0x17   :  { %p79_p11 = por %p78_p10, %p77_p9 }
  0x19   :  { %p80_p12 = pnand %p79_p11, %p73_p8 }
  0x1b   :  { %83 = shalt.err (!%p80_p12)
}
  0x1c   :  { %s84_s0 = scalar_lea.hbm %s144_s2, 256 }
  0x1d   :  { %p85_p13 = scmp.ne.s32.totalorder %s144_s2, %s84_s0  ;;  %p88_p0 = scmp.lt.u32.totalorder %s84_s0, %s144_s2 }
  0x1f   :  { %p90_p1 = pnand %p88_p0, %p85_p13 }
  0x21   :  { %93 = shalt.err (!%p90_p1)
}
  0x22   :  { %42 = dma.vmem_to_hbm [thread:$0]  %s40_s24, 256, %s144_s2, [#allocation5]  }
  0x23   :  { %96 = dma.done.wait [#allocation5], 256  }
  0x24   :  { %97 = vsyncadd [#allocation5], 4294967040 }
  0x25   :  { %46 = vsyncpa [#allocation4], 1 }
  0x26   :  { %47 = vsyncpa [#allocation5], 1 }

</bundles_post_ra>
